<compile_context>
chip_gen: v7x
topology: tpu7x:2x2x1
jax: 0.10.0
libtpu: 0.0.40
codegen_flags: <defaults>
</compile_context>

<pallas_src>
import jax
import jax.numpy as jnp
from jax.experimental import pallas as pl
from jax.experimental.pallas import tpu as pltpu

# Net architecture (from the PyTorch module):
#   fc0: 36  -> 200, ReLU
#   fc1: 200 -> 200, ReLU
#   fc2: 200 -> 50,  ReLU
#   fc3: 50  -> 2
DIMS = (36, 200, 200, 50, 2)
NUM_LAYERS = len(DIMS) - 1

W_DTYPE = jnp.bfloat16   # MXU-native weights; accumulation is pinned to f32.

H_PAD = 256      # 200 -> 256 lane padding for the fc0/fc1 outputs
H2_PAD = 128     # 50  -> 128 lane padding for the fc2 output
OUT_PAD = 128    # 2   -> 128 lane padding for the fc3 output (lane-dense store)


def _round_up(x, m):
    return ((x + m - 1) // m) * m


def mlp_kernel(x_ref, w0_ref, w1_ref, w2_ref, w3_ref, b_ref, o_ref):
    """One batch tile: four Linear layers (ReLU on the first three).

    x_ref  : (tile_b, 36)   f32   input tile (no lane padding needed)
    w0_ref : (36, 256)      bf16  fc0 weight (transposed, out-padded)
    w1_ref : (256, 256)     bf16  fc1 weight
    w2_ref : (256, 128)     bf16  fc2 weight
    w3_ref : (128, 128)     bf16  fc3 weight
    b_ref  : (4, 256)       f32   packed biases (layers 2/3 use lanes 0:128)
    o_ref  : (tile_b, 128)  f32   padded output tile (real logits in cols 0:2)
    """
    bf16 = jnp.bfloat16
    f32 = jnp.float32

    # fc0: (tile_b, 36) @ (36, 256)
    h = jnp.dot(x_ref[...].astype(bf16), w0_ref[...], preferred_element_type=f32)
    h = jnp.maximum(h + b_ref[0:1, :], 0.0)

    # fc1: (tile_b, 256) @ (256, 256)
    h = jnp.dot(h.astype(bf16), w1_ref[...], preferred_element_type=f32)
    h = jnp.maximum(h + b_ref[1:2, :], 0.0)

    # fc2: (tile_b, 256) @ (256, 128)  -> 128-wide hidden
    h = jnp.dot(h.astype(bf16), w2_ref[...], preferred_element_type=f32)
    h = jnp.maximum(h + b_ref[2:3, :H2_PAD], 0.0)

    # fc3: (tile_b, 128) @ (128, 128)  -> lane-dense 128-wide output
    h = jnp.dot(h.astype(bf16), w3_ref[...], preferred_element_type=f32)
    o_ref[...] = (h + b_ref[3:4, :OUT_PAD]).astype(o_ref.dtype)


def pack_params(params, w_dtype=W_DTYPE):
    """Pack the 4 (W, b) pairs into zero-padded, lane-dense slabs.

    params[i] = (W_i, b_i) with W_i of shape (fan_in, fan_out) (== PyTorch weight.T).
    """
    (w0, b0), (w1, b1), (w2, b2), (w3, b3) = params
    w0_p = jnp.zeros((DIMS[0], H_PAD), w_dtype).at[:, :DIMS[1]].set(w0.astype(w_dtype))
    w1_p = jnp.zeros((H_PAD, H_PAD), w_dtype).at[:DIMS[1], :DIMS[2]].set(w1.astype(w_dtype))
    w2_p = jnp.zeros((H_PAD, H2_PAD), w_dtype).at[:DIMS[2], :DIMS[3]].set(w2.astype(w_dtype))
    w3_p = jnp.zeros((H2_PAD, OUT_PAD), w_dtype).at[:DIMS[3], :DIMS[4]].set(w3.astype(w_dtype))

    b_slab = jnp.zeros((NUM_LAYERS, H_PAD), jnp.float32)
    for i, (_, b) in enumerate(params):
        b_slab = b_slab.at[i, : b.shape[0]].set(b.astype(jnp.float32))
    return (w0_p, w1_p, w2_p, w3_p, b_slab)


def net_forward(x, packed, *, max_tile_b=1024):
    """Batch-tiled forward pass.  x: (B, 36) -> (B, 2)."""
    w0, w1, w2, w3, b_slab = packed
    B = x.shape[0]

    # Tile selection: waste at most a few rows of padding, and give v7x's two
    # TensorCores at least two batch tiles when there is enough work.
    n_tiles = pl.cdiv(B, max_tile_b)
    if B >= 16:
        n_tiles = max(n_tiles, 2)
    tile_b = _round_up(pl.cdiv(B, n_tiles), 8)   # sublane dim must be multiple of 8
    B_pad = tile_b * n_tiles

    x_f32 = x.astype(jnp.float32)
    if B_pad != B:
        x_f32 = jnp.pad(x_f32, ((0, B_pad - B), (0, 0)))

    flops = 2 * B_pad * (DIMS[0] * H_PAD + H_PAD * H_PAD + H_PAD * H2_PAD + H2_PAD * OUT_PAD)
    bytes_accessed = (
        B_pad * DIMS[0] * 4
        + sum(int(w.size) * w.dtype.itemsize for w in (w0, w1, w2, w3))
        + int(b_slab.size) * 4
        + B_pad * OUT_PAD * 4
    )

    out_pad = pl.pallas_call(
        mlp_kernel,
        out_shape=jax.ShapeDtypeStruct((B_pad, OUT_PAD), jnp.float32),
        grid=(n_tiles,),
        in_specs=[
            # x streams per batch tile; last block dim == full array dim (36).
            pl.BlockSpec((tile_b, DIMS[0]), lambda i: (i, 0)),
            # Parameter slabs: constant index_map -> fetched once, VMEM-resident.
            pl.BlockSpec((DIMS[0], H_PAD), lambda i: (0, 0)),
            pl.BlockSpec((H_PAD, H_PAD), lambda i: (0, 0)),
            pl.BlockSpec((H_PAD, H2_PAD), lambda i: (0, 0)),
            pl.BlockSpec((H2_PAD, OUT_PAD), lambda i: (0, 0)),
            pl.BlockSpec((NUM_LAYERS, H_PAD), lambda i: (0, 0)),
        ],
        out_specs=pl.BlockSpec((tile_b, OUT_PAD), lambda i: (i, 0)),
        compiler_params=pltpu.CompilerParams(
            dimension_semantics=("parallel",),   # shard batch tiles across TCs (v7x)
        ),
        cost_estimate=pl.CostEstimate(
            flops=flops, transcendentals=0, bytes_accessed=bytes_accessed),
    )(x_f32, w0, w1, w2, w3, b_slab)

    return out_pad[:B, :DIMS[-1]]


def init_params(key):
    """Deterministic init mimicking nn.Linear's U(-1/sqrt(in), 1/sqrt(in))."""
    params = []
    for i in range(NUM_LAYERS):
        fan_in, fan_out = DIMS[i], DIMS[i + 1]
        key, kw, kb = jax.random.split(key, 3)
        bound = 1.0 / jnp.sqrt(float(fan_in))
        # Stored as (in, out) == PyTorch weight.T so the kernel computes x @ W + b.
        w = jax.random.uniform(kw, (fan_in, fan_out), jnp.float32, -bound, bound)
        b = jax.random.uniform(kb, (fan_out,), jnp.float32, -bound, bound)
        params.append((w, b))
    return params


def reference_forward(x, params, *, emulate_bf16=True):
    """Pure-JAX reference.  With emulate_bf16=True it mirrors the kernel's numerics:
    bf16-rounded weights/activations, exact f32 accumulation, f32 bias/ReLU."""
    h = x.astype(jnp.float32)
    for i, (w, b) in enumerate(params):
        if emulate_bf16:
            h_in = h.astype(jnp.bfloat16).astype(jnp.float32)
            w_in = w.astype(jnp.bfloat16).astype(jnp.float32)
        else:
            h_in, w_in = h, w
        h = jnp.dot(h_in, w_in, precision=jax.lax.Precision.HIGHEST) + b
        if i < len(params) - 1:
            h = jnp.maximum(h, 0.0)
    return h


if __name__ == "__main__":
    key = jax.random.PRNGKey(0)
    key, kx, kx2 = jax.random.split(key, 3)

    params = init_params(key)
    packed = pack_params(params)

    # Small-shape check (single grid step, ragged batch padded to 8).
    B = 8
    x = jax.random.normal(kx, (B, DIMS[0]), dtype=jnp.float32)
    out = jax.block_until_ready(net_forward(x, packed))
    ref = reference_forward(x, params, emulate_bf16=True)
    assert out.shape == (B, DIMS[-1]), out.shape
    assert jnp.allclose(out, ref, atol=1e-3, rtol=1e-3), "mismatch vs reference (B=8)"

    # Multi-step grid check (exercises batch tiling, ragged padding, resident weights).
    B2 = 520
    x2 = jax.random.normal(kx2, (B2, DIMS[0]), dtype=jnp.float32)
    out2 = jax.block_until_ready(net_forward(x2, packed))
    ref2 = reference_forward(x2, params, emulate_bf16=True)
    assert out2.shape == (B2, DIMS[-1]), out2.shape
    assert jnp.allclose(out2, ref2, atol=1e-3, rtol=1e-3), "mismatch vs reference (B=520)"

    print("KERNEL_OK")
</pallas_src>

<mosaic_0001>
module attributes {stable_mosaic.version = 11 : i64} {
  func.func @mlp_kernel(%arg0: i32, %arg1: memref<8x36xf32, #tpu.memory_space<vmem>>, %arg2: memref<36x256xbf16, #tpu.memory_space<vmem>>, %arg3: memref<256x256xbf16, #tpu.memory_space<vmem>>, %arg4: memref<256x128xbf16, #tpu.memory_space<vmem>>, %arg5: memref<128x128xbf16, #tpu.memory_space<vmem>>, %arg6: memref<4x256xf32, #tpu.memory_space<vmem>>, %arg7: memref<8x128xf32, #tpu.memory_space<vmem>>) attributes {dimension_semantics = [#tpu.dimension_semantics<parallel>], iteration_bounds = array<i64: 1>, scalar_prefetch = 0 : i64, scratch_operands = 0 : i64, tpu.core_type = #tpu.core_type<tc>, window_params = [{transform_indices = @transform_0, window_bounds = array<i64: 8, 36>}, {pipeline_mode = #tpu.pipeline_mode<synchronous>, transform_indices = @transform_1, window_bounds = array<i64: 36, 256>}, {pipeline_mode = #tpu.pipeline_mode<synchronous>, transform_indices = @transform_2, window_bounds = array<i64: 256, 256>}, {pipeline_mode = #tpu.pipeline_mode<synchronous>, transform_indices = @transform_3, window_bounds = array<i64: 256, 128>}, {pipeline_mode = #tpu.pipeline_mode<synchronous>, transform_indices = @transform_4, window_bounds = array<i64: 128, 128>}, {pipeline_mode = #tpu.pipeline_mode<synchronous>, transform_indices = @transform_5, window_bounds = array<i64: 4, 256>}, {transform_indices = @transform_6, window_bounds = array<i64: 8, 128>}]} {
    %c0 = arith.constant 0 : index
    %c0_0 = arith.constant 0 : index
    %0 = vector.load %arg1[%c0, %c0_0] : memref<8x36xf32, #tpu.memory_space<vmem>>, vector<8x36xf32>
    %1 = arith.truncf %0 : vector<8x36xf32> to vector<8x36xbf16>
    %c0_1 = arith.constant 0 : index
    %c0_2 = arith.constant 0 : index
    %2 = vector.load %arg2[%c0_1, %c0_2] : memref<36x256xbf16, #tpu.memory_space<vmem>>, vector<36x256xbf16>
    %cst = arith.constant dense<0.000000e+00> : vector<8x256xf32>
    %3 = tpu.matmul %1, %2, %cst {dimension_numbers = #tpu.dot_dimension_numbers<[1], [0], [0], [1], [0, 0, 1, 1], [], []>} : vector<8x36xbf16>, vector<36x256xbf16>, vector<8x256xf32> -> vector<8x256xf32>
    %c0_3 = arith.constant 0 : index
    %c0_4 = arith.constant 0 : index
    %4 = vector.load %arg6[%c0_3, %c0_4] : memref<4x256xf32, #tpu.memory_space<vmem>>, vector<1x256xf32>
    %5 = vector.broadcast %4 : vector<1x256xf32> to vector<8x256xf32>
    %6 = arith.addf %3, %5 : vector<8x256xf32>
    %cst_5 = arith.constant 0.000000e+00 : f32
    %7 = vector.broadcast %cst_5 : f32 to vector<8x256xf32>
    %8 = arith.maximumf %6, %7 : vector<8x256xf32>
    %9 = arith.truncf %8 : vector<8x256xf32> to vector<8x256xbf16>
    %c0_6 = arith.constant 0 : index
    %c0_7 = arith.constant 0 : index
    %10 = vector.load %arg3[%c0_6, %c0_7] : memref<256x256xbf16, #tpu.memory_space<vmem>>, vector<256x256xbf16>
    %cst_8 = arith.constant dense<0.000000e+00> : vector<8x256xf32>
    %11 = tpu.matmul %9, %10, %cst_8 {dimension_numbers = #tpu.dot_dimension_numbers<[1], [0], [0], [1], [0, 0, 1, 1], [], []>} : vector<8x256xbf16>, vector<256x256xbf16>, vector<8x256xf32> -> vector<8x256xf32>
    %c1 = arith.constant 1 : index
    %c0_9 = arith.constant 0 : index
    %12 = vector.load %arg6[%c1, %c0_9] : memref<4x256xf32, #tpu.memory_space<vmem>>, vector<1x256xf32>
    %13 = vector.broadcast %12 : vector<1x256xf32> to vector<8x256xf32>
    %14 = arith.addf %11, %13 : vector<8x256xf32>
    %cst_10 = arith.constant 0.000000e+00 : f32
    %15 = vector.broadcast %cst_10 : f32 to vector<8x256xf32>
    %16 = arith.maximumf %14, %15 : vector<8x256xf32>
    %17 = arith.truncf %16 : vector<8x256xf32> to vector<8x256xbf16>
    %c0_11 = arith.constant 0 : index
    %c0_12 = arith.constant 0 : index
    %18 = vector.load %arg4[%c0_11, %c0_12] : memref<256x128xbf16, #tpu.memory_space<vmem>>, vector<256x128xbf16>
    %cst_13 = arith.constant dense<0.000000e+00> : vector<8x128xf32>
    %19 = tpu.matmul %17, %18, %cst_13 {dimension_numbers = #tpu.dot_dimension_numbers<[1], [0], [0], [1], [0, 0, 1, 1], [], []>} : vector<8x256xbf16>, vector<256x128xbf16>, vector<8x128xf32> -> vector<8x128xf32>
    %c2 = arith.constant 2 : index
    %c0_14 = arith.constant 0 : index
    %20 = vector.load %arg6[%c2, %c0_14] : memref<4x256xf32, #tpu.memory_space<vmem>>, vector<1x128xf32>
    %21 = vector.broadcast %20 : vector<1x128xf32> to vector<8x128xf32>
    %22 = arith.addf %19, %21 : vector<8x128xf32>
    %cst_15 = arith.constant 0.000000e+00 : f32
    %23 = vector.broadcast %cst_15 : f32 to vector<8x128xf32>
    %24 = arith.maximumf %22, %23 : vector<8x128xf32>
    %25 = arith.truncf %24 : vector<8x128xf32> to vector<8x128xbf16>
    %c0_16 = arith.constant 0 : index
    %c0_17 = arith.constant 0 : index
    %26 = vector.load %arg5[%c0_16, %c0_17] : memref<128x128xbf16, #tpu.memory_space<vmem>>, vector<128x128xbf16>
    %cst_18 = arith.constant dense<0.000000e+00> : vector<8x128xf32>
    %27 = tpu.matmul %25, %26, %cst_18 {dimension_numbers = #tpu.dot_dimension_numbers<[1], [0], [0], [1], [0, 0, 1, 1], [], []>} : vector<8x128xbf16>, vector<128x128xbf16>, vector<8x128xf32> -> vector<8x128xf32>
    %c3 = arith.constant 3 : index
    %c0_19 = arith.constant 0 : index
    %28 = vector.load %arg6[%c3, %c0_19] : memref<4x256xf32, #tpu.memory_space<vmem>>, vector<1x128xf32>
    %29 = vector.broadcast %28 : vector<1x128xf32> to vector<8x128xf32>
    %30 = arith.addf %27, %29 : vector<8x128xf32>
    %c0_20 = arith.constant 0 : index
    %c0_21 = arith.constant 0 : index
    %31 = vector.load %arg7[%c0_20, %c0_21] : memref<8x128xf32, #tpu.memory_space<vmem>>, vector<8x128xf32>
    tpu.vector_store %arg7[%c0_20, %c0_21], %30 {strides = array<i32>} : memref<8x128xf32, #tpu.memory_space<vmem>>, vector<8x128xf32>,
    return
  }
  func.func @transform_0(%arg0: i32) -> (i32, i32) {
    %c0_i32 = arith.constant 0 : i32
    %c0_i32_0 = arith.constant 0 : i32
    return %arg0, %c0_i32 : i32, i32
  }
  func.func @transform_1(%arg0: i32) -> (i32, i32) {
    %c0_i32 = arith.constant 0 : i32
    %c0_i32_0 = arith.constant 0 : i32
    %c0_i32_1 = arith.constant 0 : i32
    return %c0_i32, %c0_i32_0 : i32, i32
  }
  func.func @transform_2(%arg0: i32) -> (i32, i32) {
    %c0_i32 = arith.constant 0 : i32
    %c0_i32_0 = arith.constant 0 : i32
    %c0_i32_1 = arith.constant 0 : i32
    return %c0_i32, %c0_i32_0 : i32, i32
  }
  func.func @transform_3(%arg0: i32) -> (i32, i32) {
    %c0_i32 = arith.constant 0 : i32
    %c0_i32_0 = arith.constant 0 : i32
    %c0_i32_1 = arith.constant 0 : i32
    return %c0_i32, %c0_i32_0 : i32, i32
  }
  func.func @transform_4(%arg0: i32) -> (i32, i32) {
    %c0_i32 = arith.constant 0 : i32
    %c0_i32_0 = arith.constant 0 : i32
    %c0_i32_1 = arith.constant 0 : i32
    return %c0_i32, %c0_i32_0 : i32, i32
  }
  func.func @transform_5(%arg0: i32) -> (i32, i32) {
    %c0_i32 = arith.constant 0 : i32
    %c0_i32_0 = arith.constant 0 : i32
    %c0_i32_1 = arith.constant 0 : i32
    return %c0_i32, %c0_i32_0 : i32, i32
  }
  func.func @transform_6(%arg0: i32) -> (i32, i32) {
    %c0_i32 = arith.constant 0 : i32
    %c0_i32_0 = arith.constant 0 : i32
    return %arg0, %c0_i32 : i32, i32
  }
}

</mosaic_0001>

<bundles_post_ra>
// kernel: tpu_custom_call.1
= control target key start
LH: loop header
LB: loop body
LE: loop exit
PB: predicated region body
PF: predicated region fallthrough
CT: control target
= control target key end

     0   :  { %11 = vsyncpa [#allocation3], 0  ;;  %s1245_s0 = inlined_call_operand.hbm [shape: f32[8,36], index: 0, kind: input, shape index: {}]   ;;  %s1246_s1 = inlined_call_operand.hbm [shape: bf16[36,256], index: 1, kind: input, shape index: {}]   ;;  %s1247_s2 = inlined_call_operand.hbm [shape: bf16[256,256], index: 2, kind: input, shape index: {}]   ;;  %s1248_s3 = inlined_call_operand.hbm [shape: bf16[256,128], index: 3, kind: input, shape index: {}]   ;;  %s1249_s4 = inlined_call_operand.hbm [shape: bf16[128,128], index: 4, kind: input, shape index: {}]   ;;  %s1250_s5 = inlined_call_operand.vmem [shape: f32[4,256], index: 5, kind: input, shape index: {}]   ;;  %s1251_s6 = inlined_call_operand.hbm [shape: f32[8,128], index: 6, kind: output, shape index: {}]  }
   0x1   :  { %12 = vsyncpa [#allocation6], 0 }
   0x2   :  { %13 = vsyncpa [#allocation9], 0 }
   0x3   :  { %14 = vsyncpa [#allocation4], 0  ;;  %s1094_s21 = smov [#allocation5]   ;;  %s954_s25 = scalar_lea.hbm %s1246_s1, 640 }
   0x4   :  { %s30_s22 = sshll.u32 %s1094_s21, 4  ;;  %p955_p0 = scmp.ne.s32.totalorder %s1246_s1, %s954_s25  ;;  %s31_s22 = int_to_ptr.vmem [resolvable:$true] %s30_s22 }
   0x5   :  { %p958_p1 = scmp.lt.u32.totalorder %s954_s25, %s1246_s1 }
   0x7   :  { %p960_p2 = pnand %p958_p1, %p955_p0 }
   0x9   :  { %963 = shalt.err (!%p960_p2)
}
   0xa   :  { %s964_s30 = scalar_lea.vmem %s31_s22, 640  ;;  %p969_p4 = scmp.lt.s32.totalorder %s31_s22, %s31_s22 }
   0xb   :  { %p965_p3 = scmp.ne.s32.totalorder %s31_s22, %s964_s30  ;;  %p970_p5 = scmp.lt.s32.totalorder %s964_s30, %s964_s30 }
   0xd   :  { %p971_p6 = por %p970_p5, %p969_p4 }
   0xf   :  { %p972_p7 = pnand %p971_p6, %p965_p3 }
  0x11   :  { %975 = shalt.err (!%p972_p7)
}
  0x12   :  { %s1095_s7 = smov 128   ;;  %s1096_s8 = smov 8  }
  0x13   :  { %36 = dma.hbm_to_vmem [thread:$0]  %s1246_s1, 640, %s31_s22, [#allocation6], %s1095_s7, %s1095_s7, %s1096_s8  }
  0x14   :  { %s1097_s11 = smov [#allocation8]   ;;  %s976_s15 = scalar_lea.hbm %s1248_s3, 2048 }
  0x15   :  { %s54_s12 = sshll.u32 %s1097_s11, 4  ;;  %p977_p8 = scmp.ne.s32.totalorder %s1248_s3, %s976_s15  ;;  %s55_s12 = int_to_ptr.vmem [resolvable:$true] %s54_s12 }
  0x16   :  { %p980_p9 = scmp.lt.u32.totalorder %s976_s15, %s1248_s3 }
  0x18   :  { %p982_p10 = pnand %p980_p9, %p977_p8 }
  0x1a   :  { %985 = shalt.err (!%p982_p10)
}
  0x1b   :  { %s986_s20 = scalar_lea.vmem %s55_s12, 2048  ;;  %p991_p12 = scmp.lt.s32.totalorder %s55_s12, %s55_s12 }
  0x1c   :  { %p987_p11 = scmp.ne.s32.totalorder %s55_s12, %s986_s20  ;;  %p992_p13 = scmp.lt.s32.totalorder %s986_s20, %s986_s20 }
  0x1e   :  { %p993_p0 = por %p992_p13, %p991_p12 }
  0x20   :  { %p994_p1 = pnand %p993_p0, %p987_p11 }
  0x22   :  { %997 = shalt.err (!%p994_p1)
}
  0x23   :  { %s1098_s1 = smov 64   ;;  %s1099_s21 = smov 4  }
  0x24   :  { %60 = dma.hbm_to_vmem [thread:$0]  %s1248_s3, 2048, %s55_s12, [#allocation9], %s1098_s1, %s1098_s1, %s1099_s21  }
  0x25   :  { %s1100_s24 = smov [#allocation2]   ;;  %s1101_s26 = smov [#allocation7]  }
  0x26   :  { %s21_s25 = sshll.u32 %s1100_s24, 4  ;;  %s42_s27 = sshll.u32 %s1101_s26, 4  ;;  %s22_s25 = int_to_ptr.vmem [resolvable:$true] %s21_s25  ;;  %s1172_s27 = int_to_ptr.vmem [resolvable:$true] %s42_s27 }
  0x27   :  { %s998_s30 = scalar_lea.hbm %s1245_s0, 128 }
  0x28   :  { %p999_p2 = scmp.ne.s32.totalorder %s1245_s0, %s998_s30  ;;  %p1002_p3 = scmp.lt.u32.totalorder %s998_s30, %s1245_s0 }
  0x2a   :  { %p1004_p4 = pnand %p1002_p3, %p999_p2 }
  0x2c   :  { %1007 = shalt.err (!%p1004_p4)
}
  0x2d   :  { %s1008_s3 = scalar_lea.vmem %s22_s25, 128  ;;  %p1013_p6 = scmp.lt.s32.totalorder %s22_s25, %s22_s25 }
  0x2e   :  { %p1009_p5 = scmp.ne.s32.totalorder %s22_s25, %s1008_s3  ;;  %p1014_p7 = scmp.lt.s32.totalorder %s1008_s3, %s1008_s3 }
  0x30   :  { %p1015_p8 = por %p1014_p7, %p1013_p6 }
  0x32   :  { %p1016_p9 = pnand %p1015_p8, %p1009_p5 }
  0x34   :  { %1019 = shalt.err (!%p1016_p9)
}
  0x35   :  { %24 = dma.hbm_to_vmem [thread:$0]  %s1245_s0, 128, %s22_s25, [#allocation3]  }
  0x36   :  { %s1020_s17 = scalar_lea.hbm %s1247_s2, 4096 }
  0x37   :  { %p1021_p10 = scmp.ne.s32.totalorder %s1247_s2, %s1020_s17  ;;  %p1024_p11 = scmp.lt.u32.totalorder %s1020_s17, %s1247_s2 }
  0x39   :  { %p1026_p12 = pnand %p1024_p11, %p1021_p10 }
  0x3b   :  { %1029 = shalt.err (!%p1026_p12)
}
  0x3c   :  { %s1030_s23 = scalar_lea.vmem %s1172_s27, 4096  ;;  %p1035_p0 = scmp.lt.s32.totalorder %s1172_s27, %s1172_s27 }
  0x3d   :  { %p1031_p13 = scmp.ne.s32.totalorder %s1172_s27, %s1030_s23  ;;  %p1036_p1 = scmp.lt.s32.totalorder %s1030_s23, %s1030_s23 }
  0x3f   :  { %p1037_p2 = por %p1036_p1, %p1035_p0 }
  0x41   :  { %p1038_p3 = pnand %p1037_p2, %p1031_p13 }
  0x43   :  { %1041 = shalt.err (!%p1038_p3)
}
  0x44   :  { %48 = dma.hbm_to_vmem [thread:$0]  %s1247_s2, 4096, %s1172_s27, [#allocation6], %s1095_s7, %s1095_s7, %s1096_s8  }
  0x45   :  { %s1102_s25 = smov [#allocation10]   ;;  %s1042_s30 = scalar_lea.hbm %s1249_s4, 1024 }
  0x46   :  { %s66_s26 = sshll.u32 %s1102_s25, 4  ;;  %p1043_p4 = scmp.ne.s32.totalorder %s1249_s4, %s1042_s30  ;;  %s67_s26 = int_to_ptr.vmem [resolvable:$true] %s66_s26 }
  0x47   :  { %p1046_p5 = scmp.lt.u32.totalorder %s1042_s30, %s1249_s4 }
  0x49   :  { %p1048_p6 = pnand %p1046_p5, %p1043_p4 }
  0x4b   :  { %1051 = shalt.err (!%p1048_p6)
}
  0x4c   :  { %s1052_s3 = scalar_lea.vmem %s67_s26, 1024  ;;  %p1057_p8 = scmp.lt.s32.totalorder %s67_s26, %s67_s26 }
  0x4d   :  { %p1053_p7 = scmp.ne.s32.totalorder %s67_s26, %s1052_s3  ;;  %p1058_p9 = scmp.lt.s32.totalorder %s1052_s3, %s1052_s3 }
  0x4f   :  { %p1059_p10 = por %p1058_p9, %p1057_p8 }
  0x51   :  { %p1060_p11 = pnand %p1059_p10, %p1053_p7 }
  0x53   :  { %1063 = shalt.err (!%p1060_p11)
}
  0x54   :  { %72 = dma.hbm_to_vmem [thread:$0]  %s1249_s4, 1024, %s67_s26, [#allocation9], %s1098_s1, %s1098_s1, %s1099_s21  }
  0x55   :  { %1086 = dma.done.wait [#allocation3], 128  }
  0x56   :  { %1087 = vsyncadd [#allocation3], 4294967168 }
  0x57   :  { %1088 = dma.done.wait [#allocation6], 4736  }
  0x58   :  { %1089 = vsyncadd [#allocation6], 4294962560 }
  0x59   :  { %1090 = dma.done.wait [#allocation9], 3072  }
  0x5a   :  { %1091 = vsyncadd [#allocation9], 4294964224  ;;  %v1103_v0 = vmov 0   ;;  %v874_v1 = vld [vmem:[#allocation5 + $0x4] ss:$8 sps:$4 sm:$0xff]   ;;  %vm139_vm0 = vcmask 1041408   ;;  %v100_v55 = vlaneseq }
  0x5b   :  { %178 = vmatprep.mubr.bf16.mxu0 %v1103_v0  ;;  %v876_v2 = vld [vmem:[#allocation5] ss:$8 sps:$4 sm:$0xff]   ;;  %146 = vmatprep.subr.bf16.mxu0 %v874_v1  ;;  %v877_v3 = vld [vmem:[#allocation5 + $0x14] ss:$8 sps:$4 sm:$0xff]   ;;  %v879_v5 = vld [vmem:[#allocation5 + $0x10] ss:$8 sps:$4 sm:$0xff]  }
  0x5c   :  { %v97_v4 = vld [vmem:[#allocation5 + $0x20] sm:$0x33]  ;;  %147 = vmatpush1.bf16.msra.mxu0 %v876_v2  ;;  %v882_v8 = vld [vmem:[#allocation7 + $0x4] ss:$8 sps:$4 sm:$0xff]   ;;  %v884_v9 = vld [vmem:[#allocation7] ss:$8 sps:$4 sm:$0xff]  }
  0x5d   :  { %148 = vmatprep.subr.bf16.mxu0 %v877_v3  ;;  %v748_v6 = vcombine.high %v97_v4, %v97_v4  ;;  %v747_v7 = vcombine.low %v97_v4, %v97_v4  ;;  %v885_v10 = vld [vmem:[#allocation7 + $0x14] ss:$8 sps:$4 sm:$0xff]   ;;  %396 = vmatprep.subr.bf16.mxu1 %v882_v8  ;;  %v887_v12 = vld [vmem:[#allocation7 + $0x10] ss:$8 sps:$4 sm:$0xff]   ;;  %v888_v14 = vld [vmem:[#allocation7 + $0x24] ss:$8 sps:$4 sm:$0xff]  }
  0x5e   :  { %v91_v11 = vld [vmem:[#allocation2] sm:$0xff]  ;;  %397 = vmatpush1.bf16.msra.mxu1 %v884_v9  ;;  %vm135_vm1 = vcmask 293888   ;;  %v890_v16 = vld [vmem:[#allocation7 + $0x20] ss:$8 sps:$4 sm:$0xff]   ;;  %v894_v19 = vld [vmem:[#allocation7 + $0x44] ss:$8 sps:$4 sm:$0xff]  }
  0x5f   :  { %v141_v13 = vsel %vm139_vm0, %v747_v7, 0  ;;  %398 = vmatprep.subr.bf16.mxu1 %v885_v10  ;;  %v92_v15 = vpack.c.bf16 %v91_v11, %v91_v11  ;;  %v891_v17 = vld [vmem:[#allocation7 + $0x34] ss:$8 sps:$4 sm:$0xff]   ;;  %v893_v18 = vld [vmem:[#allocation7 + $0x30] ss:$8 sps:$4 sm:$0xff]   ;;  %v930_v43 = vld [vmem:[#allocation8 + $0x40] sm:$0xff]  }
  0x60   :  { %149 = vmatpush1.bf16.msra.mxu0 %v879_v5  ;;  %v896_v20 = vld [vmem:[#allocation7 + $0x40] ss:$8 sps:$4 sm:$0xff]   ;;  %v897_v21 = vld [vmem:[#allocation7 + $0x54] ss:$8 sps:$4 sm:$0xff]   ;;  %v899_v22 = vld [vmem:[#allocation7 + $0x50] ss:$8 sps:$4 sm:$0xff]  }
  0x61   :  { %749 = vmatprep.subr.msk.bf16.mxu0 %vm139_vm0, %v748_v6  ;;  %v900_v23 = vld [vmem:[#allocation7 + $0x64] ss:$8 sps:$4 sm:$0xff]   ;;  %v902_v24 = vld [vmem:[#allocation7 + $0x60] ss:$8 sps:$4 sm:$0xff]   ;;  %v903_v25 = vld [vmem:[#allocation7 + $0x74] ss:$8 sps:$4 sm:$0xff]  }
  0x62   :  { %399 = vmatpush1.bf16.msra.mxu1 %v887_v12  ;;  %v905_v26 = vld [vmem:[#allocation7 + $0x70] ss:$8 sps:$4 sm:$0xff]   ;;  %v906_v27 = vld [vmem:[#allocation7 + $0x84] ss:$8 sps:$4 sm:$0xff]   ;;  %v908_v28 = vld [vmem:[#allocation7 + $0x80] ss:$8 sps:$4 sm:$0xff]  }
  0x63   :  { %400 = vmatprep.subr.bf16.mxu1 %v888_v14  ;;  %v909_v29 = vld [vmem:[#allocation7 + $0x94] ss:$8 sps:$4 sm:$0xff]   ;;  %v911_v30 = vld [vmem:[#allocation7 + $0x90] ss:$8 sps:$4 sm:$0xff]   ;;  %v912_v31 = vld [vmem:[#allocation7 + $0xa4] ss:$8 sps:$4 sm:$0xff]  }
  0x64   :  { %151 = vmatpush1.bf16.msra.mxu0 %v141_v13  ;;  %v914_v32 = vld [vmem:[#allocation7 + $0xa0] ss:$8 sps:$4 sm:$0xff]   ;;  %v915_v33 = vld [vmem:[#allocation7 + $0xb4] ss:$8 sps:$4 sm:$0xff]   ;;  %v917_v34 = vld [vmem:[#allocation7 + $0xb0] ss:$8 sps:$4 sm:$0xff]  }
  0x65   :  { %v918_v35 = vld [vmem:[#allocation7 + $0xc4] ss:$8 sps:$4 sm:$0xff]   ;;  %v920_v36 = vld [vmem:[#allocation7 + $0xc0] ss:$8 sps:$4 sm:$0xff]   ;;  %v921_v37 = vld [vmem:[#allocation7 + $0xd4] ss:$8 sps:$4 sm:$0xff]   ;;  %810 = vmatprep.subr.bf16.mxu0 %v930_v43 }
  0x66   :  { %401 = vmatpush1.bf16.msra.mxu1 %v890_v16  ;;  %v923_v38 = vld [vmem:[#allocation7 + $0xd0] ss:$8 sps:$4 sm:$0xff]   ;;  %v924_v39 = vld [vmem:[#allocation7 + $0xe4] ss:$8 sps:$4 sm:$0xff]   ;;  %v926_v40 = vld [vmem:[#allocation7 + $0xe0] ss:$8 sps:$4 sm:$0xff]  }
  0x67   :  { %750 = vmatmul.mubr.msk.bf16.vlgmr.msra.gmra.mrb[0].mxu0 %vm135_vm1, %v92_v15  ;;  %402 = vmatprep.subr.bf16.mxu1 %v891_v17  ;;  %v927_v41 = vld [vmem:[#allocation7 + $0xf4] ss:$8 sps:$4 sm:$0xff]   ;;  %v929_v42 = vld [vmem:[#allocation7 + $0xf0] ss:$8 sps:$4 sm:$0xff]   ;;  %v931_v44 = vld [vmem:[#allocation8] sm:$0xff]   ;;  %v101_v56 = vshrl.u32 %v100_v55, 7 }
  0x68   :  { %v932_v45 = vld [vmem:[#allocation8 + $0x48] sm:$0xff]   ;;  %811 = vmatpush3.bf16.msra.mxu0 %v931_v44  ;;  %v934_v47 = vld [vmem:[#allocation8 + $0x50] sm:$0xff]   ;;  %v936_v49 = vld [vmem:[#allocation8 + $0x58] sm:$0xff]   ;;  %v1104_v12 = vmov 0.0   ;;  %vm1105_vm2 = vmmov 0   ;;  %s1106_s16 = smov [#allocation11]  }
  0x69   :  { %v933_v46 = vld [vmem:[#allocation8 + $0x8] sm:$0xff]   ;;  %812 = vmatprep.subr.bf16.mxu0 %v932_v45  ;;  %v935_v48 = vld [vmem:[#allocation8 + $0x10] sm:$0xff]   ;;  %v937_v50 = vld [vmem:[#allocation8 + $0x18] sm:$0xff]   ;;  %v102_v57 = vsub.s32 0, %v101_v56  ;;  %v106_v59 = vsub.s32 1, %v101_v56  ;;  %s732_s17 = sshll.u32 %s1106_s16, 4  ;;  %s733_s17 = int_to_ptr.vmem [resolvable:$true] %s732_s17 }
  0x6a   :  { %403 = vmatpush1.bf16.msra.mxu1 %v893_v18  ;;  %v938_v51 = vld [vmem:[#allocation8 + $0x60] sm:$0xff]   ;;  %v940_v53 = vld [vmem:[#allocation8 + $0x68] sm:$0xff]   ;;  %v98_v58 = vld [vmem:[%s1250_s5] ss:$4 sm:$0x3]  ;;  %s1064_s18 = scalar_lea.vmem %s733_s17, 128  ;;  %p1069_p13 = scmp.lt.s32.totalorder %s733_s17, %s733_s17 }
  0x6b   :  { %404 = vmatprep.subr.bf16.mxu1 %v894_v19  ;;  %v939_v52 = vld [vmem:[#allocation8 + $0x20] sm:$0xff]   ;;  %v941_v54 = vld [vmem:[#allocation8 + $0x28] sm:$0xff]   ;;  %v103_v60 = vrot.slane %v98_v58, %v102_v57  ;;  %v107_v61 = vrot.slane %v98_v58, %v106_v59  ;;  %v942_v8 = vld [vmem:[#allocation8 + $0x70] sm:$0xff]   ;;  %p1065_p12 = scmp.ne.s32.totalorder %s733_s17, %s1064_s18  ;;  %p1070_p0 = scmp.lt.s32.totalorder %s1064_s18, %s1064_s18 }
  0x6c   :  { %813 = vmatpush3.bf16.msra.mxu0 %v933_v46  ;;  %v943_v9 = vld [vmem:[#allocation8 + $0x30] sm:$0xff]   ;;  %v944_v10 = vld [vmem:[#allocation8 + $0x78] sm:$0xff]  }
  0x6d   :  { %814 = vmatprep.subr.bf16.mxu0 %v934_v47  ;;  %v945_v11 = vld [vmem:[#allocation8 + $0x38] sm:$0xff]   ;;  %v751_v13 = vld [vmem:[%s1250_s5 + $0x1] ss:$4 sm:$0x3]  ;;  %v801_v43 = vld [vmem:[%s1250_s5 + $0x3] ss:$0 sm:$0xff]  ;;  %p1071_p1 = por %p1070_p0, %p1069_p13 }
  0x6e   :  { %405 = vmatpush1.bf16.msra.mxu1 %v896_v20  ;;  %v229_v14 = vrot.slane %v751_v13, %v102_v57  ;;  %v233_v15 = vrot.slane %v751_v13, %v106_v59 }
  0x6f   :  { %406 = vmatprep.subr.bf16.mxu1 %v897_v21  ;;  %p1072_p2 = pnand %p1071_p1, %p1065_p12 }
  0x70   :  { %815 = vmatpush3.bf16.msra.mxu0 %v935_v48 }
  0x71   :  { %816 = vmatprep.subr.bf16.mxu0 %v936_v49 }
  0x72   :  { %407 = vmatpush1.bf16.msra.mxu1 %v899_v22 }
  0x73   :  { %408 = vmatprep.subr.bf16.mxu1 %v900_v23 }
  0x74   :  { %817 = vmatpush3.bf16.msra.mxu0 %v937_v50 }
  0x75   :  { %818 = vmatprep.subr.bf16.mxu0 %v938_v51 }
  0x76   :  { %409 = vmatpush1.bf16.msra.mxu1 %v902_v24 }
  0x77   :  { %410 = vmatprep.subr.bf16.mxu1 %v903_v25  ;;  %v946_v25 = vld [vmem:[#allocation10] sm:$0xff]  }
  0x78   :  { %819 = vmatpush3.bf16.msra.mxu0 %v939_v52 }
  0x79   :  { %820 = vmatprep.subr.bf16.mxu0 %v940_v53 }
  0x7a   :  { %411 = vmatpush1.bf16.msra.mxu1 %v905_v26 }
  0x7b   :  { %412 = vmatprep.subr.bf16.mxu1 %v906_v27  ;;  %v947_v27 = vld [vmem:[#allocation10 + $0x8] sm:$0xff]  }
  0x7c   :  { %821 = vmatpush3.bf16.msra.mxu0 %v941_v54 }
  0x7d   :  { %822 = vmatprep.subr.bf16.mxu0 %v942_v8 }
  0x7e   :  { %413 = vmatpush1.bf16.msra.mxu1 %v908_v28  ;;  %v948_v28 = vld [vmem:[#allocation10 + $0x10] sm:$0xff]  }
  0x7f   :  { %414 = vmatprep.subr.bf16.mxu1 %v909_v29  ;;  %v949_v29 = vld [vmem:[#allocation10 + $0x18] sm:$0xff]  }
  0x80   :  { %823 = vmatpush3.bf16.msra.mxu0 %v943_v9 }
  0x81   :  { %824 = vmatprep.subr.bf16.mxu0 %v944_v10 }
  0x82   :  { %415 = vmatpush1.bf16.msra.mxu1 %v911_v30  ;;  %v950_v30 = vld [vmem:[#allocation10 + $0x20] sm:$0xff]  }
  0x83   :  { %416 = vmatprep.subr.bf16.mxu1 %v912_v31  ;;  %v951_v31 = vld [vmem:[#allocation10 + $0x28] sm:$0xff]  }
  0x84   :  { %825 = vmatpush3.bf16.msra.mxu0 %v945_v11 }
  0x85   :  { %841 = vmatprep.subr.bf16.mxu0 %v1104_v12 }
  0x86   :  { %417 = vmatpush1.bf16.msra.mxu1 %v914_v32  ;;  %v952_v32 = vld [vmem:[#allocation10 + $0x30] sm:$0xff]  }
  0x87   :  { %418 = vmatprep.subr.bf16.mxu1 %v915_v33  ;;  %v953_v33 = vld [vmem:[#allocation10 + $0x38] sm:$0xff]  }
  0x8a   :  { %419 = vmatpush1.bf16.msra.mxu1 %v917_v34 }
  0x8b   :  { %420 = vmatprep.subr.bf16.mxu1 %v918_v35  ;;  %v784_v35 = vld [vmem:[%s1250_s5 + $0x2] ss:$0 sm:$0xff] }
  0x8e   :  { %421 = vmatpush1.bf16.msra.mxu1 %v920_v36 }
  0x8f   :  { %422 = vmatprep.subr.bf16.mxu1 %v921_v37 }
  0x92   :  { %423 = vmatpush1.bf16.msra.mxu1 %v923_v38 }
  0x93   :  { %424 = vmatprep.subr.bf16.mxu1 %v924_v39 }
  0x96   :  { %425 = vmatpush1.bf16.msra.mxu1 %v926_v40 }
  0x97   :  { %426 = vmatprep.subr.bf16.mxu1 %v927_v41 }
  0x9a   :  { %427 = vmatpush1.bf16.msra.mxu1 %v929_v42 }
 0x13a   :  { %v180_v62 = vpop.f32.mrb[0].mxu0 }
 0x13b   :  { %v181_v63 = vadd.f32 %v180_v62, %v103_v60  ;;  %v182_v0 = vpop.f32.mrb[1].mxu0 }
 0x13c   :  { %v183_v1 = vadd.f32 %v182_v0, %v107_v61  ;;  %v184_v2 = vpop.f32.mrb[2].mxu0 }
 0x13d   :  { %v187_v3 = vmax.f32 %v181_v63, 0.0  ;;  %v185_v4 = vpop.f32.mrb[3].mxu0 }
 0x13e   :  { %v188_v5 = vmax.f32 %v183_v1, 0.0 }
 0x13f   :  { %v189_v7 = vpack.c.bf16 %v187_v3, %v187_v3 }
 0x140   :  { %v190_v6 = vpack.c.bf16 %v188_v5, %v188_v5 }
 0x142   :  { %428 = vmatprep.mubr.bf16.mxu1 %v190_v6 }
 0x143   :  { %429 = vmatmul.mubr.bf16.vlgmr.msra.gmra.mrb[0].mxu1 %v189_v7 }
 0x216   :  { %v430_v16 = vpop.f32.mrb[0].mxu1 }
 0x217   :  { %v431_v17 = vadd.f32 %v430_v16, %v229_v14  ;;  %v432_v18 = vpop.f32.mrb[1].mxu1 }
 0x218   :  { %v433_v19 = vadd.f32 %v432_v18, %v233_v15  ;;  %v434_v20 = vpop.f32.mrb[2].mxu1 }
 0x219   :  { %v437_v21 = vmax.f32 %v431_v17, 0.0  ;;  %v435_v22 = vpop.f32.mrb[3].mxu1 }
 0x21a   :  { %v438_v23 = vmax.f32 %v433_v19, 0.0 }
 0x21b   :  { %v439_v26 = vpack.c.bf16 %v437_v21, %v437_v21 }
 0x21c   :  { %v440_v24 = vpack.c.bf16 %v438_v23, %v438_v23 }
 0x21e   :  { %606 = vmatprep.mubr.bf16.mxu0 %v440_v24 }
 0x21f   :  { %607 = vmatmul.mubr.bf16.vlgmr.msra.gmra.mrb[4].mxu0 %v439_v26 }
 0x220   :  { %842 = vmatpush3.bf16.msra.mxu0 %v946_v25  ;;  %857 = vmatprep.mubr.msk.bf16.mxu0 %vm1105_vm2, %v1104_v12 }
 0x221   :  { %843 = vmatprep.subr.bf16.mxu0 %v1104_v12 }
 0x224   :  { %844 = vmatpush3.bf16.msra.mxu0 %v947_v27 }
 0x225   :  { %845 = vmatprep.subr.bf16.mxu0 %v1104_v12 }
 0x228   :  { %846 = vmatpush3.bf16.msra.mxu0 %v948_v28 }
 0x229   :  { %847 = vmatprep.subr.bf16.mxu0 %v1104_v12 }
 0x22c   :  { %848 = vmatpush3.bf16.msra.mxu0 %v949_v29 }
 0x22d   :  { %849 = vmatprep.subr.bf16.mxu0 %v1104_v12 }
 0x230   :  { %850 = vmatpush3.bf16.msra.mxu0 %v950_v30 }
 0x231   :  { %851 = vmatprep.subr.bf16.mxu0 %v1104_v12 }
 0x234   :  { %852 = vmatpush3.bf16.msra.mxu0 %v951_v31 }
 0x235   :  { %853 = vmatprep.subr.bf16.mxu0 %v1104_v12 }
 0x238   :  { %854 = vmatpush3.bf16.msra.mxu0 %v952_v32 }
 0x239   :  { %855 = vmatprep.subr.bf16.mxu0 %v1104_v12 }
 0x23c   :  { %856 = vmatpush3.bf16.msra.mxu0 %v953_v33 }
 0x2f2   :  { %v826_v34 = vpop.f32.mrb[4].mxu0 }
 0x2f3   :  { %v827_v36 = vpop.f32.mrb[5].mxu0 }
 0x2f4   :  { %v828_v37 = vadd.f32 %v827_v36, %v826_v34  ;;  %v829_v38 = vpop.f32.mrb[6].mxu0 }
 0x2f5   :  { %v830_v39 = vpop.f32.mrb[7].mxu0 }
 0x2f6   :  { %v609_v40 = vadd.f32 %v828_v37, %v784_v35 }
 0x2f8   :  { %v614_v41 = vmax.f32 %v609_v40, 0.0 }
 0x2fa   :  { %v615_v42 = vpack.c.bf16 %v614_v41, %v614_v41 }
 0x2fc   :  { %858 = vmatmul.mubr.bf16.vlgmr.msra.gmra.mrb[8].mxu0 %v615_v42 }
 0x3cf   :  { %v719_v44 = vpop.f32.mrb[8].mxu0 }
 0x3d0   :  { %v720_v45 = vadd.f32 %v801_v43, %v719_v44  ;;  %v859_v46 = vpop.f32.mrb[9].mxu0 }
 0x3d1   :  { %v722_v47 = vpop.f32.mrb[10].mxu0 }
 0x3d2   :  { %725 = vst [vmem:[#allocation11] sm:$0xff] %v720_v45  ;;  %v860_v48 = vpop.f32.mrb[11].mxu0 }
 0x3d3   :  { %1075 = shalt.err (!%p1072_p2)
}
 0x3d4   :  { %s1076_s5 = scalar_lea.hbm %s1251_s6, 128 }
 0x3d5   :  { %p1077_p3 = scmp.ne.s32.totalorder %s1251_s6, %s1076_s5  ;;  %p1080_p4 = scmp.lt.u32.totalorder %s1076_s5, %s1251_s6 }
 0x3d7   :  { %p1082_p5 = pnand %p1080_p4, %p1077_p3 }
 0x3d9   :  { %1085 = shalt.err (!%p1082_p5)
}
 0x3da   :  { %735 = dma.vmem_to_hbm [thread:$0]  %s733_s17, 128, %s1251_s6, [#allocation4]  }
 0x3db   :  { %1092 = dma.done.wait [#allocation4], 128  }
 0x3dc   :  { %1093 = vsyncadd [#allocation4], 4294967168 }
 0x3dd   :  { %739 = vsyncpa [#allocation3], 1 }
 0x3de   :  { %740 = vsyncpa [#allocation6], 1 }
 0x3df   :  { %741 = vsyncpa [#allocation9], 1 }
 0x3e0   :  { %742 = vsyncpa [#allocation4], 1 }

</bundles_post_ra>
